<compile_context>
chip_gen: v7x
topology: tpu7x:2x2x1
jax: 0.10.0
libtpu: 0.0.40
codegen_flags: <defaults>
</compile_context>

<pallas_src>
import jax
import jax.numpy as jnp
from jax.experimental import pallas as pl
from jax.experimental.pallas import tpu as pltpu

_LANE = 128
_MAX_LANE_TILE = 16384                 # raised from 2048 per perf review
_FOLD_BELOW_L = _LANE                  # fold batch into lanes only when L is lane-sparse
_VMEM_LIMIT_BYTES = 32 * 1024 * 1024   # scoped-VMEM budget; fits v5e/v6e/v7x
_TILE_VMEM_BUDGET = 24 * 1024 * 1024   # double-buffered x+out blocks stay under this (v7x-safe)


def _decoder_kernel(x_ref, w_ref, b_ref, o_ref):
    # x_ref: (B_in, TL)   w_ref: (N_out, B_in)   b_ref: (N_out, 1)   o_ref: (N_out, TL)
    acc = jnp.dot(w_ref[...], x_ref[...], preferred_element_type=jnp.float32)
    acc = acc + b_ref[...]                              # f32 bias broadcast over lanes
    # sigmoid(x) == 0.5 * tanh(0.5 * x) + 0.5  -> one EUP transcendental + 2 VPU ops
    o_ref[...] = (0.5 * jnp.tanh(0.5 * acc) + 0.5).astype(o_ref.dtype)


def _round_up(v, m):
    return -(-int(v) // m) * m


def _choose_lane_tile(total_lanes, b_in, n_out, itemsize, min_tiles=1):
    """Largest lane tile (multiple of 128 unless full-extent) within the VMEM budget.

    If min_tiles > 1 (v7x megacore: both TensorCores need work), shrink the tile
    so the lane axis yields at least that many grid steps when possible.
    """
    total_lanes = int(total_lanes)
    per_lane = 2 * (b_in + n_out) * itemsize            # double-buffered input + output
    by_vmem = max(_LANE, (_TILE_VMEM_BUDGET // per_lane) // _LANE * _LANE)
    tl = min(_MAX_LANE_TILE, by_vmem)
    if total_lanes <= tl:
        tl = total_lanes                                # full-extent block is always legal
    if min_tiles > 1 and total_lanes >= min_tiles * _LANE:
        split_tl = _round_up(pl.cdiv(total_lanes, min_tiles), _LANE)
        tl = min(tl, split_tl)
    return int(tl)


def decoder_forward(x, weight, bias):
    """x: (batch, B_in, L); weight: (N_out, B_in, 1); bias: (N_out,).

    I/O dtype follows x.dtype (pass bf16 x / weight for the bf16-I/O fast path
    on v6e/v7x); math is always f32 inside the kernel.
    """
    batch, b_in, length = x.shape
    n_out = weight.shape[0]
    itemsize = jnp.dtype(x.dtype).itemsize

    w2d = weight[:, :, 0].astype(x.dtype)               # (N_out, B_in), resident
    b2d = bias.reshape(n_out, 1).astype(jnp.float32)    # (N_out, 1), f32 for the add

    cost = pl.CostEstimate(
        flops=2 * batch * length * n_out * b_in,
        transcendentals=batch * length * n_out,          # one tanh per output element
        bytes_accessed=(batch * length * (b_in + n_out)) * itemsize
        + w2d.size * itemsize + b2d.size * 4,
    )

    def _cparams(sem):
        return pltpu.CompilerParams(
            dimension_semantics=sem, vmem_limit_bytes=_VMEM_LIMIT_BYTES)

    if batch > 1 and length < _FOLD_BELOW_L:
        # --- lane-sparse regime (L < 128): fold batch into the lane axis ------
        # The wrapper transposes cost extra HBM traffic but beat masked stores
        # on sub-128 output rows; this branch is deliberately narrow.
        total = batch * length
        tl = _choose_lane_tile(total, b_in, n_out, itemsize, min_tiles=2)
        x2d = jnp.transpose(x, (1, 0, 2)).reshape(b_in, total)      # (B_in, batch*L)
        out2d = pl.pallas_call(
            _decoder_kernel,
            out_shape=jax.ShapeDtypeStruct((n_out, total), x.dtype),
            grid_spec=pltpu.PrefetchScalarGridSpec(
                num_scalar_prefetch=0,
                grid=(pl.cdiv(total, tl),),
                in_specs=[
                    pl.BlockSpec((b_in, tl), lambda j: (0, j)),
                    pl.BlockSpec((n_out, b_in), lambda j: (0, 0)),
                    pl.BlockSpec((n_out, 1), lambda j: (0, 0)),
                ],
                out_specs=pl.BlockSpec((n_out, tl), lambda j: (0, j)),
            ),
            compiler_params=_cparams(("parallel",)),
            cost_estimate=cost,
        )(x2d, w2d, b2d)
        return jnp.transpose(out2d.reshape(n_out, batch, length), (1, 0, 2))

    # --- general path: tile the length axis per batch element ----------------
    # If batch == 1, force >=2 lane tiles so both v7x TensorCores are fed.
    tl = _choose_lane_tile(length, b_in, n_out, itemsize,
                           min_tiles=2 if batch == 1 else 1)
    return pl.pallas_call(
        _decoder_kernel,
        out_shape=jax.ShapeDtypeStruct((batch, n_out, length), x.dtype),
        grid_spec=pltpu.PrefetchScalarGridSpec(
            num_scalar_prefetch=0,
            grid=(batch, pl.cdiv(length, tl)),
            in_specs=[
                pl.BlockSpec((pl.Squeezed(), b_in, tl), lambda b, j: (b, 0, j)),
                pl.BlockSpec((n_out, b_in), lambda b, j: (0, 0)),
                pl.BlockSpec((n_out, 1), lambda b, j: (0, 0)),
            ],
            out_specs=pl.BlockSpec((pl.Squeezed(), n_out, tl),
                                   lambda b, j: (b, 0, j)),
        ),
        compiler_params=_cparams(("parallel", "parallel")),
        cost_estimate=cost,
    )(x, w2d, b2d)


def _reference(x, weight2d, bias):
    return jax.nn.sigmoid(
        jnp.einsum("nc,bcl->bnl", weight2d, x) + bias[None, :, None])


if __name__ == "__main__":
    # Decoder(N, B) maps B channels -> N channels over the length axis.
    B_ch, N_ch = 32, 64

    key = jax.random.PRNGKey(0)
    kx1, kx2, kx3, kx4, kw, kb = jax.random.split(key, 6)

    # PyTorch Conv1d default init: U(-1/sqrt(fan_in), 1/sqrt(fan_in)), fan_in = B_ch.
    bound = 1.0 / jnp.sqrt(jnp.float32(B_ch))
    weight = jax.random.uniform(kw, (N_ch, B_ch, 1), dtype=jnp.float32,
                                minval=-bound, maxval=bound)
    bias = jax.random.uniform(kb, (N_ch,), dtype=jnp.float32,
                              minval=-bound, maxval=bound)
    w2d_f32 = weight[:, :, 0]

    fwd = jax.jit(decoder_forward)

    # Case 1: batch=2, L=128 -> per-batch grid path (lane-dense, no fold), grid (2, 1).
    x1 = jax.random.normal(kx1, (2, B_ch, 128), dtype=jnp.float32)
    out1 = jax.block_until_ready(fwd(x1, weight, bias))
    assert out1.shape == (2, N_ch, 128)
    assert jnp.allclose(out1, _reference(x1, w2d_f32, bias), atol=2e-5, rtol=2e-5)

    # Case 2: batch=1, L=1000 -> lane axis split for v7x megacore (grid (1, 2)),
    #         with a masked partial last tile.
    x2 = jax.random.normal(kx2, (1, B_ch, 1000), dtype=jnp.float32)
    out2 = jax.block_until_ready(fwd(x2, weight, bias))
    assert out2.shape == (1, N_ch, 1000)
    assert jnp.allclose(out2, _reference(x2, w2d_f32, bias), atol=2e-5, rtol=2e-5)

    # Case 3: batch=4, L=96 (< 128) -> lane-sparse fold path (batch folded into lanes).
    x3 = jax.random.normal(kx3, (4, B_ch, 96), dtype=jnp.float32)
    out3 = jax.block_until_ready(fwd(x3, weight, bias))
    assert out3.shape == (4, N_ch, 96)
    assert jnp.allclose(out3, _reference(x3, w2d_f32, bias), atol=2e-5, rtol=2e-5)

    # Case 4: bf16 I/O path (halved HBM bytes; f32 math inside the kernel).
    x4 = jax.random.normal(kx4, (2, B_ch, 256), dtype=jnp.float32).astype(jnp.bfloat16)
    out4 = jax.block_until_ready(fwd(x4, weight.astype(jnp.bfloat16), bias))
    assert out4.shape == (2, N_ch, 256) and out4.dtype == jnp.bfloat16
    ref4 = _reference(x4.astype(jnp.float32),
                      w2d_f32.astype(jnp.bfloat16).astype(jnp.float32), bias)
    assert jnp.allclose(out4.astype(jnp.float32), ref4, atol=2e-2, rtol=2e-2)

    print("KERNEL_OK")
</pallas_src>

<mosaic_0001>
module attributes {stable_mosaic.version = 11 : i64} {
  func.func @_decoder_kernel(%arg0: i32, %arg1: i32, %arg2: memref<1x32x128xf32, #tpu.memory_space<vmem>>, %arg3: memref<64x32xf32, #tpu.memory_space<vmem>>, %arg4: memref<64x1xf32, #tpu.memory_space<vmem>>, %arg5: memref<1x64x128xf32, #tpu.memory_space<vmem>>) attributes {dimension_semantics = [#tpu.dimension_semantics<parallel>, #tpu.dimension_semantics<parallel>], iteration_bounds = array<i64: 2, 1>, scalar_prefetch = 0 : i64, scratch_operands = 0 : i64, tpu.core_type = #tpu.core_type<tc>, window_params = [{transform_indices = @transform_0, window_bounds = array<i64: 1, 32, 128>}, {pipeline_mode = #tpu.pipeline_mode<synchronous>, transform_indices = @transform_1, window_bounds = array<i64: 64, 32>}, {pipeline_mode = #tpu.pipeline_mode<synchronous>, transform_indices = @transform_2, window_bounds = array<i64: 64, 1>}, {transform_indices = @transform_3, window_bounds = array<i64: 1, 64, 128>}]} {
    %c0 = arith.constant 0 : index
    %c0_0 = arith.constant 0 : index
    %0 = vector.load %arg3[%c0, %c0_0] : memref<64x32xf32, #tpu.memory_space<vmem>>, vector<64x32xf32>
    %c0_1 = arith.constant 0 : index
    %c0_2 = arith.constant 0 : index
    %c0_3 = arith.constant 0 : index
    %1 = vector.load %arg2[%c0_1, %c0_2, %c0_3] : memref<1x32x128xf32, #tpu.memory_space<vmem>>, vector<1x32x128xf32>
    %2 = vector.shape_cast %1 : vector<1x32x128xf32> to vector<32x128xf32>
    %cst = arith.constant dense<0.000000e+00> : vector<64x128xf32>
    %3 = tpu.matmul %0, %2, %cst {dimension_numbers = #tpu.dot_dimension_numbers<[1], [0], [0], [1], [0, 0, 1, 1], [], []>} : vector<64x32xf32>, vector<32x128xf32>, vector<64x128xf32> -> vector<64x128xf32>
    %c0_4 = arith.constant 0 : index
    %c0_5 = arith.constant 0 : index
    %4 = vector.load %arg4[%c0_4, %c0_5] : memref<64x1xf32, #tpu.memory_space<vmem>>, vector<64x1xf32>
    %5 = vector.broadcast %4 : vector<64x1xf32> to vector<64x128xf32>
    %6 = arith.addf %3, %5 : vector<64x128xf32>
    %cst_6 = arith.constant 5.000000e-01 : f32
    %7 = vector.broadcast %cst_6 : f32 to vector<64x128xf32>
    %8 = arith.mulf %7, %6 : vector<64x128xf32>
    %9 = math.tanh %8 : vector<64x128xf32>
    %cst_7 = arith.constant 5.000000e-01 : f32
    %10 = vector.broadcast %cst_7 : f32 to vector<64x128xf32>
    %11 = arith.mulf %10, %9 : vector<64x128xf32>
    %cst_8 = arith.constant 5.000000e-01 : f32
    %12 = vector.broadcast %cst_8 : f32 to vector<64x128xf32>
    %13 = arith.addf %11, %12 : vector<64x128xf32>
    %c0_9 = arith.constant 0 : index
    %c0_10 = arith.constant 0 : index
    %c0_11 = arith.constant 0 : index
    %14 = vector.load %arg5[%c0_9, %c0_10, %c0_11] : memref<1x64x128xf32, #tpu.memory_space<vmem>>, vector<1x64x128xf32>
    %15 = vector.shape_cast %14 : vector<1x64x128xf32> to vector<64x128xf32>
    %16 = vector.shape_cast %13 : vector<64x128xf32> to vector<1x64x128xf32>
    tpu.vector_store %arg5[%c0_9, %c0_10, %c0_11], %16 {strides = array<i32>} : memref<1x64x128xf32, #tpu.memory_space<vmem>>, vector<1x64x128xf32>,
    return
  }
  func.func @transform_0(%arg0: i32, %arg1: i32) -> (i32, i32, i32) {
    %c0_i32 = arith.constant 0 : i32
    %c0_i32_0 = arith.constant 0 : i32
    return %arg0, %c0_i32, %arg1 : i32, i32, i32
  }
  func.func @transform_1(%arg0: i32, %arg1: i32) -> (i32, i32) {
    %c0_i32 = arith.constant 0 : i32
    %c0_i32_0 = arith.constant 0 : i32
    %c0_i32_1 = arith.constant 0 : i32
    return %c0_i32, %c0_i32_0 : i32, i32
  }
  func.func @transform_2(%arg0: i32, %arg1: i32) -> (i32, i32) {
    %c0_i32 = arith.constant 0 : i32
    %c0_i32_0 = arith.constant 0 : i32
    %c0_i32_1 = arith.constant 0 : i32
    return %c0_i32, %c0_i32_0 : i32, i32
  }
  func.func @transform_3(%arg0: i32, %arg1: i32) -> (i32, i32, i32) {
    %c0_i32 = arith.constant 0 : i32
    %c0_i32_0 = arith.constant 0 : i32
    return %arg0, %c0_i32, %arg1 : i32, i32, i32
  }
}

</mosaic_0001>

<bundles_post_ra>
// kernel: decoder_forward.1
= control target key start
LH: loop header
LB: loop body
LE: loop exit
PB: predicated region body
PF: predicated region fallthrough
CT: control target
= control target key end

     0   :  { %8 = vsyncpa [#allocation3], 0  ;;  %s939_s0 = inlined_call_operand.vmem [shape: f32[2,32,128], index: 0, kind: input, shape index: {}]   ;;  %s940_s1 = inlined_call_operand.vmem [shape: f32[64,32], index: 1, kind: input, shape index: {}]   ;;  %s941_s2 = inlined_call_operand.vmem [shape: f32[64,1], index: 2, kind: input, shape index: {}]   ;;  %s942_s3 = inlined_call_operand.hbm [shape: f32[2,64,128], index: 3, kind: output, shape index: {}]  }
   0x1   :  { %10 = vsyncpa [#allocation3 + $0x1], 0  ;;  %s764_s12 = smov 0   ;;  %s766_s13 = smov 0  }
   0x2   :  { %s768_s14 = smov 0   ;;  %s770_s15 = smov 0  }
   0x3   :  { %s772_s16 = smov 0   ;;  %s774_s17 = smov 0  }
   0x4 LB: > { %s517_s18 = sadd.s32 4294967295, %s738_s17   ;;  %s518_s19 = sadd.s32 4294967294, %s738_s17   ;;  %s738_s17 = sphi %s774_s17, %s16_s17   ;;  %s734_s16 = sphi %s772_s16, %s949_s16   ;;  %s730_s15 = sphi %s770_s15, %s948_s15   ;;  %s726_s14 = sphi %s768_s14, %s947_s14   ;;  %s722_s13 = sphi %s766_s13, %s946_s13   ;;  %s718_s12 = sphi %s764_s12, %s945_s12  }
   0x5   : > { %s28_s20 = sadd.s32 1, %s734_s16  ;;  %s107_s21 = sadd.s32 1, %s726_s14 }
   0x6   : > { %p30_p0 = scmp.ge.s32.totalorder %s28_s20, 2  ;;  %p117_p1 = scmp.ne.s32.totalorder %s726_s14, %s722_s13 }
   0x7   : > { %p118_p2 = scmp.eq.s32.totalorder %s517_s18, 1  ;;  %p123_p3 = scmp.ne.s32.totalorder %s722_s13, %s718_s12 }
   0x8   : > { %s951_s20 = smov (%p30_p0, %s28_s20), 0  ;;  %p124_p5 = scmp.eq.s32.totalorder %s518_s19, 1 }
   0x9   : > { %p804_p4 = por %p118_p2, %p117_p1  ;;  %s102_s23 = ssub.s32 %s734_s16, %s951_s20 }
   0xa   : > { %p521_p6 = scmp.ge.s32.totalorder %s738_s17, 1  ;;  %p105_p7 = scmp.eq.s32.totalorder %s102_s23, 0 }
   0xb   : > { %p811_p8 = por %p124_p5, %p123_p3  ;;  %p159_p9 = scmp.lt.s32.totalorder %s738_s17, 3 }
   0xc   : > { %s817_s25 = scalar_select %p105_p7, %s726_s14, %s107_s21  }
   0xd   : > { %p160_p10 = pnand %p521_p6, %p159_p9 }
   0xe   : > { %p186_p11 = scmp.lt.s32.totalorder (!%p160_p10), %s730_s15, 1  ;;  %v194_v0 = vld [vmem:[%s940_s1] sm:$0xff] (!%p160_p10)  ;;  %vm254_vm0 = vcmask (!%p160_p10), 261120   ;;  %v740_v2 = vmov (!%p160_p10), 0   ;;  %v208_v3 = vld [vmem:[%s941_s2 + $0x10] sm:$0xff] (!%p160_p10)  ;;  %v209_v5 = vld [vmem:[%s941_s2 + $0x18] sm:$0xff] (!%p160_p10) }
   0xf   : > { %163 = sbr.rel (%p160_p10) target bundleno = 290 (0x122), region = 32  ;;  %v198_v1 = vld [vmem:[%s940_s1 + $0x20] sm:$0xff] (!%p160_p10)  ;;  %560 = vmatprep.mubr.msk.f32.mxu0 (!%p160_p10), %vm254_vm0, %v194_v0  ;;  %643 = vset.pattern.permute.xlu1 (!%p160_p10), %v740_v2  ;;  %v207_v6 = vld [vmem:[%s941_s2 + $0x8] sm:$0xff] (!%p160_p10)  ;;  %v213_v15 = vld [vmem:[%s941_s2 + $0x38] sm:$0xff] (!%p160_p10)  ;;  %s183_s29 = sand.u32 (!%p160_p10), 1, %s722_s13  }
  0x10   : > { %566 = vmatprep.mubr.msk.f32.mxu1 (!%p160_p10), %vm254_vm0, %v198_v1  ;;  %642 = vset.pattern.permute.xlu0 (!%p160_p10), %v740_v2  ;;  %v206_v4 = vld [vmem:[%s941_s2] sm:$0xff] (!%p160_p10)  ;;  %v211_v13 = vld [vmem:[%s941_s2 + $0x28] sm:$0xff] (!%p160_p10)  ;;  %v212_v16 = vld [vmem:[%s941_s2 + $0x30] sm:$0xff] (!%p160_p10)  ;;  %s539_s5 = sshll.u32 (!%p160_p10), %s730_s15, 10  ;;  %s741_s11 = smov (!%p160_p10), [#allocation2]  }
  0x11   : > { %226 = vperm.xlu1 (!%p160_p10), %643, %v208_v3   ;;  %216 = vperm.xlu0 (!%p160_p10), %642, %v206_v4   ;;  %v210_v14 = vld [vmem:[%s941_s2 + $0x20] sm:$0xff] (!%p160_p10)  ;;  %v195_v17 = vld [vmem:[%s940_s1 + $0x8] sm:$0xff] (!%p160_p10)  ;;  %v196_v19 = vld [vmem:[%s940_s1 + $0x10] sm:$0xff] (!%p160_p10)  ;;  %s887_s9 = scalar_lea.hbm (!%p160_p10), %s942_s3, %s539_s5  ;;  %s664_s18 = sshll.u32 (!%p160_p10), %s741_s11, 4  ;;  %s665_s18 = int_to_ptr.vmem [resolvable:$false] %s664_s18 }
  0x12   : > { %v199_v18 = vld [vmem:[%s940_s1 + $0x28] sm:$0xff] (!%p160_p10)  ;;  %v200_v20 = vld [vmem:[%s940_s1 + $0x30] sm:$0xff] (!%p160_p10)  ;;  %v197_v21 = vld [vmem:[%s940_s1 + $0x18] sm:$0xff] (!%p160_p10) }
  0x13   : > { %v201_v22 = vld [vmem:[%s940_s1 + $0x38] sm:$0xff] (!%p160_p10) }
  0x15   : > { %231 = vperm.xlu1 (!%p160_p10), %643, %v209_v5   ;;  %221 = vperm.xlu0 (!%p160_p10), %642, %v207_v6  }
  0x16   : > { %s187_s30 = scalar_select %p186_p11, %s730_s15, 1 }
  0x17   : > { %s893_s15 = scalar_lea.sflag [#allocation3], %s183_s29 }
  0x18   : > { %s538_s8 = sshll.u32 %s187_s30, 5  ;;  %s522_s30 = sshll.u32 %s183_s29, 6 }
  0x19   : > { %s193_s19 = scalar_lea.vmem %s939_s0, %s538_s8  ;;  %241 = vperm.xlu1 %643, %v211_v13   ;;  %236 = vperm.xlu0 %642, %v210_v14   ;;  %s185_s4 = scalar_lea.vmem [#allocation2], %s522_s30 }
  0x1a   : > { %v202_v7 = vld [vmem:[%s193_s19] sm:$0xff]  ;;  %v203_v8 = vld [vmem:[%s193_s19 + $0x8] sm:$0xff]  ;;  %v204_v9 = vld [vmem:[%s193_s19 + $0x10] sm:$0xff]  ;;  %s439_s6 = sshll.u32 %s185_s4, 4  ;;  %s889_s6 = int_to_ptr.vmem [resolvable:$true] %s439_s6 }
  0x1b   : > { %v572_v10 = vpack.c.bf16 %v203_v8, %v202_v7  ;;  %v205_v11 = vld [vmem:[%s193_s19 + $0x18] sm:$0xff]  ;;  %s660_s10 = scalar_lea.vmem %s889_s6, 1024  ;;  %s666_s19 = scalar_lea.vmem %s665_s18, 2048 }
  0x1c   : > { %v576_v12 = vpack.c.bf16 %v205_v11, %v204_v9  ;;  %p661_p12 = scmp.ne.s32.totalorder %s889_s6, %s660_s10  ;;  %p667_p1 = scmp.lt.s32.totalorder %s889_s6, %s665_s18 }
  0x1d   : > { %573 = vmatprep.subr.bf16.mxu0 %v572_v10  ;;  %580 = vmatprep.subr.bf16.mxu1 %v572_v10  ;;  %p668_p2 = scmp.lt.s32.totalorder %s666_s19, %s660_s10 }
  0x1e   : > { %575 = vmatpush3.bf16.msra.mxu0 %v572_v10  ;;  %582 = vmatpush3.bf16.msra.mxu1 %v572_v10  ;;  %p662_p13 = pnand %p661_p12, %p804_p4 }
  0x1f   : > { %577 = vmatprep.subr.bf16.mxu0 %v576_v12  ;;  %581 = vmatprep.subr.bf16.mxu1 %v576_v12  ;;  %p669_p3 = por %p668_p2, %p667_p1 }
  0x20   : > { %251 = vperm.xlu1 %643, %v213_v15   ;;  %246 = vperm.xlu0 %642, %v212_v16   ;;  %p663_p0 = pneg %p662_p13 }
  0x22   : > { %579 = vmatpush3.bf16.msra.mxu0 %v576_v12  ;;  %583 = vmatpush3.bf16.msra.mxu1 %v576_v12  ;;  %p670_p5 = pnand %p669_p3, %p663_p0 }
  0x25   : > { %561 = vmatmul.mubr.msk.f32.vlgmr.msra.gmra.mrb[0].mxu0 %vm254_vm0, %v195_v17  ;;  %567 = vmatmul.mubr.msk.f32.vlgmr.msra.gmra.mrb[0].mxu1 %vm254_vm0, %v199_v18 }
  0x26   : > { %563 = vmatprep.mubr.msk.f32.mxu0 %vm254_vm0, %v196_v19  ;;  %569 = vmatprep.mubr.msk.f32.mxu1 %vm254_vm0, %v200_v20 }
  0x29   : > { %564 = vmatmul.mubr.msk.f32.gmra.mrb[2].mxu0 %vm254_vm0, %v197_v21  ;;  %570 = vmatmul.mubr.msk.f32.gmra.mrb[2].mxu1 %vm254_vm0, %v201_v22 }
  0x90   : > { %v227_v23 = vpop.permute.xlu1 %226  ;;  %v217_v24 = vpop.permute.xlu0 %216 }
  0x94   : > { %v232_v25 = vpop.permute.xlu1 %231  ;;  %v222_v26 = vpop.permute.xlu0 %221 }
  0x98   : > { %v242_v27 = vpop.permute.xlu1 %241  ;;  %v237_v28 = vpop.permute.xlu0 %236 }
  0x9f   : > { %v252_v37 = vpop.permute.xlu1 %251  ;;  %v247_v38 = vpop.permute.xlu0 %246 }
  0xf8   : > { %v562_v29 = vpop.f32.mrb[0].mxu0  ;;  %v568_v30 = vpop.f32.mrb[0].mxu1 }
  0xf9   : > { %v351_v31 = vadd.f32 %v562_v29, %v222_v26  ;;  %v371_v32 = vadd.f32 %v568_v30, %v242_v27  ;;  %v345_v33 = vpop.f32.mrb[1].mxu0  ;;  %v365_v34 = vpop.f32.mrb[1].mxu1 }
  0xfa   : > { %v346_v35 = vadd.f32 %v345_v33, %v217_v24  ;;  %v366_v36 = vadd.f32 %v365_v34, %v237_v28 }
  0xfb   : > { %v385_v39 = vmul.f32 0.5, %v351_v31  ;;  %v389_v40 = vmul.f32 0.5, %v371_v32 }
  0xfc   : > { %v384_v41 = vmul.f32 0.5, %v346_v35  ;;  %v388_v42 = vmul.f32 0.5, %v366_v36  ;;  %v565_v43 = vpop.f32.mrb[2].mxu0  ;;  %v571_v44 = vpop.f32.mrb[2].mxu1 }
  0xfd   : > { %644 = vtanh.f32 %v385_v39  ;;  %v361_v45 = vadd.f32 %v565_v43, %v232_v25  ;;  %v381_v46 = vadd.f32 %v571_v44, %v252_v37  ;;  %v355_v47 = vpop.f32.mrb[3].mxu0  ;;  %v375_v48 = vpop.f32.mrb[3].mxu1 }
  0xfe   : > { %646 = vtanh.f32 %v389_v40  ;;  %v356_v49 = vadd.f32 %v355_v47, %v227_v23  ;;  %v376_v50 = vadd.f32 %v375_v48, %v247_v38 }
  0xff   : > { %648 = vtanh.f32 %v384_v41  ;;  %v387_v51 = vmul.f32 0.5, %v361_v45  ;;  %v391_v52 = vmul.f32 0.5, %v381_v46 }
 0x100   : > { %650 = vtanh.f32 %v388_v42  ;;  %v386_v53 = vmul.f32 0.5, %v356_v49  ;;  %v390_v54 = vmul.f32 0.5, %v376_v50 }
 0x101   : > { %652 = vtanh.f32 %v387_v51 }
 0x102   : > { %654 = vtanh.f32 %v391_v52 }
 0x103   : > { %656 = vtanh.f32 %v386_v53 }
 0x104   : > { %658 = vtanh.f32 %v390_v54 }
 0x107   : > { %v645_v55 = vpop.eup %644 }
 0x108   : > { %v647_v56 = vpop.eup %646  ;;  %v401_v57 = vmul.f32 0.5, %v645_v55 }
 0x109   : > { %v649_v58 = vpop.eup %648  ;;  %v405_v59 = vmul.f32 0.5, %v647_v56 }
 0x10a   : > { %v651_v60 = vpop.eup %650  ;;  %v409_v61 = vadd.f32 0.5, %v401_v57  ;;  %v400_v62 = vmul.f32 0.5, %v649_v58 }
 0x10b   : > { %v653_v63 = vpop.eup %652  ;;  %v413_v0 = vadd.f32 0.5, %v405_v59  ;;  %v404_v1 = vmul.f32 0.5, %v651_v60 }
 0x10c   : > { %v655_v2 = vpop.eup %654  ;;  %417 = vst [vmem:[%s185_s4 + $0x8] sm:$0xff] %v409_v61  ;;  %v408_v3 = vadd.f32 0.5, %v400_v62  ;;  %v403_v4 = vmul.f32 0.5, %v653_v63 }
 0x10d   : > { %v657_v5 = vpop.eup %656  ;;  %421 = vst [vmem:[%s185_s4 + $0x28] sm:$0xff] %v413_v0  ;;  %v412_v6 = vadd.f32 0.5, %v404_v1  ;;  %v407_v7 = vmul.f32 0.5, %v655_v2 }
 0x10e   : > { %v659_v8 = vpop.eup %658  ;;  %416 = vst [vmem:[%s185_s4] sm:$0xff] %v408_v3  ;;  %v411_v9 = vadd.f32 0.5, %v403_v4  ;;  %v402_v10 = vmul.f32 0.5, %v657_v5 }
 0x10f   : > { %420 = vst [vmem:[%s185_s4 + $0x20] sm:$0xff] %v412_v6  ;;  %v415_v11 = vadd.f32 0.5, %v407_v7  ;;  %v406_v12 = vmul.f32 0.5, %v659_v8 }
 0x110   : > { %419 = vst [vmem:[%s185_s4 + $0x18] sm:$0xff] %v411_v9  ;;  %v410_v13 = vadd.f32 0.5, %v402_v10 }
 0x111   : > { %423 = vst [vmem:[%s185_s4 + $0x38] sm:$0xff] %v415_v11  ;;  %v414_v14 = vadd.f32 0.5, %v406_v12 }
 0x112   : > { %418 = vst [vmem:[%s185_s4 + $0x10] sm:$0xff] %v410_v13 }
 0x113   : > { %422 = vst [vmem:[%s185_s4 + $0x30] sm:$0xff] %v414_v14 }
 0x114   : > { %673 = shalt.err (!%p670_p5)
}
 0x115   : > { %s674_s21 = scalar_lea.hbm %s887_s9, 1024  ;;  %s678_s27 = scalar_lea.hbm %s942_s3, 2048 }
 0x116   : > { %p675_p6 = scmp.ne.s32.totalorder %s887_s9, %s674_s21  ;;  %p679_p10 = scmp.lt.u32.totalorder %s887_s9, %s942_s3 }
 0x117   : > { %p680_p11 = scmp.lt.u32.totalorder %s678_s27, %s674_s21  ;;  %p682_p13 = scmp.lt.u32.totalorder %s674_s21, %s887_s9 }
 0x118   : > { %p676_p7 = pnand %p675_p6, %p804_p4 }
 0x119   : > { %p681_p12 = por %p680_p11, %p679_p10 }
 0x11a   : > { %p677_p9 = pneg %p676_p7 }
 0x11b   : > { %p683_p0 = por %p682_p13, %p681_p12 }
 0x11d   : > { %p684_p1 = pnand %p683_p0, %p677_p9 }
 0x11f   : > { %687 = shalt.err (!%p684_p1)
}
 0x120   : > { %s742_s30 = smov 128   ;;  %s743_s4 = smov 8  }
 0x121   : > { %584 = dma.vmem_to_hbm [thread:$0]  (%p804_p4), %s889_s6, 1024, %s887_s9, %s893_s15, %s742_s30, %s742_s30, %s743_s4  }
 0x122 PF: > { %p590_p2 = scmp.ge.s32.totalorder %s738_s17, 2  ;;  %s454_s5 = sand.u32 1, %s718_s12  }
 0x123   : > { %s455_s7 = scalar_lea.sflag [#allocation3], %s454_s5 }
 0x124   : > { %p587_p3 = pnand %p590_p2, %p811_p8 }
 0x126   : > { %713 = dma.done.wait (!%p587_p3), %s455_s7, 1024  }
 0x127   : > { %715 = vsyncadd (!%p587_p3), %s455_s7, 4294966272  ;;  %s16_s17 = sadd.s32 1, %s738_s17   ;;  %s945_s12 = smov %s722_s13 }
 0x128   : > { %p13_p5 = scmp.ge.s32.totalorder %s16_s17, 4   ;;  %s946_s13 = smov %s726_s14 }
 0x129   : > { %s947_s14 = smov %s817_s25  ;;  %s948_s15 = smov %s734_s16 }
 0x12a   : > { %s949_s16 = smov %s951_s20  ;;  %15 = sbr.rel (!%p13_p5) target bundleno = 4 (0x4), region = 67 }
 0x131   :  { %460 = vsyncpa [#allocation3], 1 }
 0x132   :  { %462 = vsyncpa [#allocation3 + $0x1], 1 }

</bundles_post_ra>
